<compile_context>
chip_gen: v5e
topology: v5e:2x2
jax: 0.10.0
libtpu: 0.0.40
codegen_flags: <defaults>
</compile_context>

<pallas_src>
import functools
import math

import jax
import jax.numpy as jnp
from jax import lax
from jax.experimental import pallas as pl
from jax.experimental.pallas import tpu as pltpu

EPS = 1e-6          # nn.LayerNorm(eps=1e-6)
MASK_BIAS = -1e30   # large finite negative (avoids -inf -> NaN on degenerate rows)


# ----------------------------- in-kernel helpers -----------------------------
def _layernorm(x, w, b):
    mu = jnp.mean(x, axis=-1, keepdims=True)
    xc = x - mu
    var = jnp.mean(xc * xc, axis=-1, keepdims=True)
    return xc * lax.rsqrt(var + EPS) * w + b


def _gelu(x):  # exact GELU (PyTorch nn.GELU default), computed in f32
    return 0.5 * x * (1.0 + lax.erf(x / jnp.sqrt(2.0).astype(x.dtype)))


# ------------------------------- shared params --------------------------------
def _vmem_limit_bytes():
    # Explicit scoped-VMEM budget (defaults of 16/32 MiB are too small for a
    # resident-weight / streamed-layer design at real ViT sizes).
    try:
        cap = int(pltpu.get_tpu_info().vmem_capacity_bytes)
    except Exception:
        cap = 128 * 1024 * 1024
    # ~100 MiB on v5e/v6e (128 MiB physical), ~48 MiB on v7x (64 MiB physical)
    return max(32 * 1024 * 1024, min(cap - 16 * 1024 * 1024, 100 * 1024 * 1024))


def _compiler_params(dimension_semantics):
    return pltpu.CompilerParams(
        dimension_semantics=dimension_semantics,
        vmem_limit_bytes=_vmem_limit_bytes(),
    )


# --------------- patch embedding (conv_proj + cls token + pos-emb) -----------
def patch_embed_kernel(patches_ref, w_ref, add_ref, out_ref):
    # conv_proj(kernel=stride=P) == linear projection of flattened patches.
    # Row 0 (cls slot) and pad rows of `patches` are zero; cls token, conv
    # bias and positional embedding are folded into `add` by the wrapper, so
    # the output write is a single dense (S_pad, D) store (no concat/shift).
    p16 = patches_ref[0].astype(jnp.bfloat16)                      # (S_pad, C*P*P)
    out_ref[0] = (
        jnp.dot(p16, w_ref[...], preferred_element_type=jnp.float32) + add_ref[0]
    )


def patch_embed(patches_pad, w_bf16, add_rows):
    B, S_pad, Dp = patches_pad.shape
    D = w_bf16.shape[1]
    return pl.pallas_call(
        patch_embed_kernel,
        out_shape=jax.ShapeDtypeStruct((B, S_pad, D), jnp.float32),
        grid=(B,),
        in_specs=[
            pl.BlockSpec((1, S_pad, Dp), lambda b: (b, 0, 0)),
            pl.BlockSpec((Dp, D), lambda b: (0, 0)),
            pl.BlockSpec((1, S_pad, D), lambda b: (0, 0, 0)),
        ],
        out_specs=pl.BlockSpec((1, S_pad, D), lambda b: (b, 0, 0)),
        compiler_params=_compiler_params(("parallel",)),
    )(patches_pad, w_bf16, add_rows)


# --------------------------- fused encoder stack ------------------------------
def encoder_stack_kernel(
    x_ref, mask_ref,
    ln1w_ref, ln1b_ref, wqkv_ref, bqkv_ref, wo_ref, bo_ref,
    ln2w_ref, ln2b_ref, w1_ref, b1_ref, w2_ref, b2_ref,
    out_ref, tok_ref, heads_ref, *, num_heads,
):
    l = pl.program_id(1)

    # running tokens live in VMEM scratch across the layer (arbitrary) axis
    @pl.when(l == 0)
    def _():
        tok_ref[...] = x_ref[0]

    x = tok_ref[...]                               # (S, D) f32
    S, D = x.shape
    hd = D // num_heads
    scale = jnp.float32(1.0 / math.sqrt(hd))

    # additive key-padding bias (computed once per layer, broadcast over rows)
    mask_row = mask_ref[...][0]                    # (1, S); 1.0 where key is padded
    mbias = jnp.where(mask_row > 0.5, MASK_BIAS, 0.0).astype(jnp.float32)

    # --- pre-LN multi-head self-attention (stats f32, matmuls bf16) ---
    xn = _layernorm(x, ln1w_ref[0], ln1b_ref[0])
    qkv = jnp.dot(xn.astype(jnp.bfloat16), wqkv_ref[0],
                  preferred_element_type=jnp.float32) + bqkv_ref[0]   # (S, 3D)
    qkv16 = qkv.astype(jnp.bfloat16)

    # TODO(synk): at real ViT sizes relayout qkv16 once to (H, S, hd)
    # (pltpu.einshape) so head extraction isn't 3*H half-vreg lane slices.
    for h in range(num_heads):                     # static loop (tiny head count)
        q = qkv16[:, h * hd:(h + 1) * hd]
        k = qkv16[:, D + h * hd:D + (h + 1) * hd]
        v = qkv16[:, 2 * D + h * hd:2 * D + (h + 1) * hd]
        # contract head dim of q and k directly (no k.T -> no explicit transpose)
        s = lax.dot_general(q, k, (((1,), (1,)), ((), ())),
                            preferred_element_type=jnp.float32)
        s = s * scale + mbias                      # (S, S) f32
        m = jnp.max(s, axis=-1, keepdims=True)
        e = jnp.exp(s - m)
        p = e * pl.reciprocal(jnp.sum(e, axis=-1, keepdims=True), approx=True)
        # store each head's output straight into the bf16 scratch: bounds live
        # ranges, removes the lane-axis concatenate entirely
        heads_ref[:, h * hd:(h + 1) * hd] = jnp.dot(
            p.astype(jnp.bfloat16), v, preferred_element_type=jnp.float32
        ).astype(jnp.bfloat16)

    # single full-K output projection on the assembled heads scratch
    attn = jnp.dot(heads_ref[...], wo_ref[0],
                   preferred_element_type=jnp.float32) + bo_ref[0]
    x1 = x + attn

    # --- pre-LN MLP ---
    # TODO(synk): for v7x (64 MiB VMEM) at ViT-L sizes, tile w1/w2 over mlp_dim
    # chunks with an extra "arbitrary" grid axis + f32 accumulator instead of
    # keeping both resident.
    yn = _layernorm(x1, ln2w_ref[0], ln2b_ref[0])
    hmid = _gelu(jnp.dot(yn.astype(jnp.bfloat16), w1_ref[0],
                         preferred_element_type=jnp.float32) + b1_ref[0])
    y = jnp.dot(hmid.astype(jnp.bfloat16), w2_ref[0],
                preferred_element_type=jnp.float32) + b2_ref[0]
    x2 = x1 + y

    tok_ref[...] = x2

    @pl.when(l == pl.num_programs(1) - 1)
    def _():
        out_ref[0] = x2


def encoder_stack(x, mask3, stacked, num_heads):
    B, S, D = x.shape
    L = stacked["wqkv"].shape[0]
    Dm = stacked["w1"].shape[2]

    def w_spec(shape):
        # per-layer stacked operand: block = one layer slice, indexed by the
        # layer grid axis (prefetched under the previous layer's compute)
        n = len(shape) - 1
        return pl.BlockSpec((1,) + tuple(shape[1:]), lambda b, l, _n=n: (l,) + (0,) * _n)

    # advisory cost estimate for the XLA scheduler
    flops = int(B * L * (8 * S * D * D + 4 * S * S * D + 4 * S * D * Dm))
    transcendentals = int(B * L * (num_heads * S * S + S * Dm))
    w_bytes = 2 * (3 * D * D + D * D + 2 * D * Dm) + 4 * (10 * D + Dm)
    bytes_accessed = int(B * L * w_bytes + 2 * B * S * D * 4 + B * S * 4)

    kern = functools.partial(encoder_stack_kernel, num_heads=num_heads)
    st = stacked
    return pl.pallas_call(
        kern,
        out_shape=jax.ShapeDtypeStruct((B, S, D), jnp.float32),
        grid=(B, L),
        in_specs=[
            pl.BlockSpec((1, S, D), lambda b, l: (b, 0, 0)),
            pl.BlockSpec((1, 1, S), lambda b, l: (b, 0, 0)),
            w_spec(st["ln1w"].shape), w_spec(st["ln1b"].shape),    # ln_1
            w_spec(st["wqkv"].shape), w_spec(st["bqkv"].shape),    # in_proj (bf16 W)
            w_spec(st["wo"].shape), w_spec(st["bo"].shape),        # out_proj (bf16 W)
            w_spec(st["ln2w"].shape), w_spec(st["ln2b"].shape),    # ln_2
            w_spec(st["w1"].shape), w_spec(st["b1"].shape),        # mlp fc1 (bf16 W)
            w_spec(st["w2"].shape), w_spec(st["b2"].shape),        # mlp fc2 (bf16 W)
        ],
        out_specs=pl.BlockSpec((1, S, D), lambda b, l: (b, 0, 0)),
        scratch_shapes=[
            pltpu.VMEM((S, D), jnp.float32),     # running tokens
            pltpu.VMEM((S, D), jnp.bfloat16),    # assembled attention heads
        ],
        compiler_params=_compiler_params(("parallel", "arbitrary")),
        cost_estimate=pl.CostEstimate(flops=flops, transcendentals=transcendentals,
                                      bytes_accessed=bytes_accessed),
    )(x, mask3,
      st["ln1w"], st["ln1b"], st["wqkv"], st["bqkv"], st["wo"], st["bo"],
      st["ln2w"], st["ln2b"], st["w1"], st["b1"], st["w2"], st["b2"])


# --------------------- final LayerNorm + global average pool -----------------
def final_ln_pool_kernel(x_ref, lnw_ref, lnb_ref, local_ref, global_ref, *, seq_len):
    xn = _layernorm(x_ref[0], lnw_ref[...], lnb_ref[...])
    local_ref[0] = xn
    # mean over the REAL sequence only (pad rows excluded)
    rows = lax.broadcasted_iota(jnp.int32, xn.shape, 0)
    valid = (rows < seq_len).astype(jnp.float32)
    global_ref[0] = jnp.sum(xn * valid, axis=0, keepdims=True) * jnp.float32(1.0 / seq_len)


def final_ln_pool(x, lnw, lnb, *, seq_len):
    B, S_pad, D = x.shape
    kern = functools.partial(final_ln_pool_kernel, seq_len=seq_len)
    return pl.pallas_call(
        kern,
        out_shape=(
            jax.ShapeDtypeStruct((B, S_pad, D), jnp.float32),
            jax.ShapeDtypeStruct((B, 1, D), jnp.float32),
        ),
        grid=(B,),
        in_specs=[
            pl.BlockSpec((1, S_pad, D), lambda b: (b, 0, 0)),
            pl.BlockSpec((1, D), lambda b: (0, 0)),
            pl.BlockSpec((1, D), lambda b: (0, 0)),
        ],
        out_specs=(
            pl.BlockSpec((1, S_pad, D), lambda b: (b, 0, 0)),
            pl.BlockSpec((1, 1, D), lambda b: (b, 0, 0)),
        ),
        compiler_params=_compiler_params(("parallel",)),
    )(x, lnw, lnb)


# --------------------------------- forward -----------------------------------
def vit_forward(x, key_padding_mask, params, *, patch_size, num_heads):
    B, C, H, W = x.shape
    P = patch_size
    n_h, n_w = H // P, W // P
    Sp = n_h * n_w
    D = params["conv_w"].shape[0]
    S = Sp + 1                                   # real sequence (cls + patches)
    S_pad = ((S + 7) // 8) * 8                   # sublane-aligned sequence
    Dp = C * P * P

    # conv_proj(kernel=stride=P)  ==  patchify + linear projection
    patches = (
        x.reshape(B, C, n_h, P, n_w, P)
        .transpose(0, 2, 4, 1, 3, 5)
        .reshape(B, Sp, Dp)
    )  # patch vector ordered (C, ph, pw) to match PyTorch conv weight layout
    # row 0 (cls slot) and pad rows are zero -> matmul contributes nothing there
    patches_pad = jnp.zeros((B, S_pad, Dp), jnp.float32).at[:, 1:S, :].set(patches)
    w_patch = params["conv_w"].reshape(D, Dp).T.astype(jnp.bfloat16)

    # fold cls token, conv bias and positional embedding into one additive term
    pos = params["pos_embedding"]                                    # (1, S, D)
    add = jnp.zeros((1, S_pad, D), jnp.float32)
    add = add.at[:, 1:S, :].set(pos[:, 1:, :] + params["conv_b"].reshape(1, 1, D))
    add = add.at[:, 0, :].set(params["class_token"].reshape(1, D) + pos[:, 0, :])

    tokens = patch_embed(patches_pad, w_patch, add)                  # (B, S_pad, D)

    # _process_padding_mask: MaxPool2d(P, P) then flatten; cls token never
    # masked; pad rows always masked so they never act as attention keys
    m = key_padding_mask.reshape(B, 1, n_h, P, n_w, P).max(axis=(3, 5)).reshape(B, Sp)
    mask = jnp.concatenate([jnp.zeros((B, 1), m.dtype), m], axis=-1)  # (B, S)
    mask_bool = mask > 0
    mask_pad = jnp.ones((B, S_pad), jnp.float32).at[:, :S].set(mask.astype(jnp.float32))
    mask3 = mask_pad.reshape(B, 1, S_pad)

    # all encoder layers in a single fused pallas_call (layer-streamed weights)
    tokens = encoder_stack(tokens, mask3, params["stack"], num_heads)

    local_pad, global3 = final_ln_pool(tokens, params["ln_w"], params["ln_b"], seq_len=S)
    return local_pad[:, :S, :], global3[:, 0, :], mask_bool


# -------------------------- deterministic parameters -------------------------
def init_params(key, *, image_size, patch_size, num_layers, hidden_dim, mlp_dim):
    # TODO(synk): no pretrained `vit_weights` checkpoint load; synthetic init.
    C = 3
    S = (image_size // patch_size) ** 2 + 1
    keys = jax.random.split(key, 2 + num_layers)

    def nrm(k, shape, std=0.02):
        return std * jax.random.normal(k, shape, jnp.float32)

    D, M, L = hidden_dim, mlp_dim, num_layers
    bf16 = jnp.bfloat16
    params = {
        "conv_w": nrm(keys[0], (D, C, patch_size, patch_size)),
        "conv_b": jnp.zeros((1, D), jnp.float32),
        "class_token": jnp.zeros((1, 1, D), jnp.float32),   # nn.Parameter(zeros)
        "pos_embedding": nrm(keys[1], (1, S, D)),
        "ln_w": jnp.ones((1, D), jnp.float32),
        "ln_b": jnp.zeros((1, D), jnp.float32),
    }
    acc = {k: [] for k in
           ("ln1w", "ln1b", "wqkv", "bqkv", "wo", "bo",
            "ln2w", "ln2b", "w1", "b1", "w2", "b2")}
    for i in range(L):
        lk = jax.random.split(keys[2 + i], 4)
        acc["ln1w"].append(jnp.ones((1, D), jnp.float32))
        acc["ln1b"].append(jnp.zeros((1, D), jnp.float32))
        acc["wqkv"].append(nrm(lk[0], (3 * D, D)).T.astype(bf16))
        acc["bqkv"].append(jnp.zeros((1, 3 * D), jnp.float32))
        acc["wo"].append(nrm(lk[1], (D, D)).T.astype(bf16))
        acc["bo"].append(jnp.zeros((1, D), jnp.float32))
        acc["ln2w"].append(jnp.ones((1, D), jnp.float32))
        acc["ln2b"].append(jnp.zeros((1, D), jnp.float32))
        acc["w1"].append(nrm(lk[2], (M, D)).T.astype(bf16))
        acc["b1"].append(jnp.zeros((1, M), jnp.float32))
        acc["w2"].append(nrm(lk[3], (D, M)).T.astype(bf16))
        acc["b2"].append(jnp.zeros((1, D), jnp.float32))
    params["stack"] = {k: jnp.stack(v) for k, v in acc.items()}   # leading layer axis
    return params


if __name__ == "__main__":
    image_size, patch_size = 16, 4
    num_layers, num_heads = 2, 4
    hidden_dim, mlp_dim = 32, 64
    B = 2

    key = jax.random.PRNGKey(0)
    kx, kp = jax.random.split(key, 2)
    x = jax.random.normal(kx, (B, 3, image_size, image_size), jnp.float32)
    # padding mask, NCHW like PyTorch: 1.0 marks padded pixels
    key_padding_mask = jnp.zeros((B, 1, image_size, image_size), jnp.float32)
    key_padding_mask = key_padding_mask.at[1, :, 8:, :].set(1.0)

    params = init_params(
        kp, image_size=image_size, patch_size=patch_size,
        num_layers=num_layers, hidden_dim=hidden_dim, mlp_dim=mlp_dim,
    )

    local_feat, global_feat, kpm = vit_forward(
        x, key_padding_mask, params, patch_size=patch_size, num_heads=num_heads,
    )
    jax.block_until_ready((local_feat, global_feat, kpm))

    S = (image_size // patch_size) ** 2 + 1
    assert local_feat.shape == (B, S, hidden_dim)
    assert global_feat.shape == (B, hidden_dim)
    assert kpm.shape == (B, S) and kpm.dtype == jnp.bool_
    assert bool(jnp.all(jnp.isfinite(local_feat))) and bool(jnp.all(jnp.isfinite(global_feat)))
    print("KERNEL_OK")
</pallas_src>

<mosaic_0001>
module attributes {stable_mosaic.version = 11 : i64} {
  func.func @patch_embed_kernel(%arg0: i32, %arg1: memref<1x24x48xf32, #tpu.memory_space<vmem>>, %arg2: memref<48x32xbf16, #tpu.memory_space<vmem>>, %arg3: memref<1x24x32xf32, #tpu.memory_space<vmem>>, %arg4: memref<1x24x32xf32, #tpu.memory_space<vmem>>) attributes {dimension_semantics = [#tpu.dimension_semantics<parallel>], iteration_bounds = array<i64: 2>, scalar_prefetch = 0 : i64, scratch_operands = 0 : i64, tpu.core_type = #tpu.core_type<tc>, window_params = [{transform_indices = @transform_0, window_bounds = array<i64: 1, 24, 48>}, {pipeline_mode = #tpu.pipeline_mode<synchronous>, transform_indices = @transform_1, window_bounds = array<i64: 48, 32>}, {pipeline_mode = #tpu.pipeline_mode<synchronous>, transform_indices = @transform_2, window_bounds = array<i64: 1, 24, 32>}, {transform_indices = @transform_3, window_bounds = array<i64: 1, 24, 32>}]} {
    %c0 = arith.constant 0 : index
    %c0_0 = arith.constant 0 : index
    %c0_1 = arith.constant 0 : index
    %0 = vector.load %arg1[%c0, %c0_0, %c0_1] : memref<1x24x48xf32, #tpu.memory_space<vmem>>, vector<1x24x48xf32>
    %1 = vector.shape_cast %0 : vector<1x24x48xf32> to vector<24x48xf32>
    %2 = arith.truncf %1 : vector<24x48xf32> to vector<24x48xbf16>
    %c0_2 = arith.constant 0 : index
    %c0_3 = arith.constant 0 : index
    %3 = vector.load %arg2[%c0_2, %c0_3] : memref<48x32xbf16, #tpu.memory_space<vmem>>, vector<48x32xbf16>
    %cst = arith.constant dense<0.000000e+00> : vector<24x32xf32>
    %4 = tpu.matmul %2, %3, %cst {dimension_numbers = #tpu.dot_dimension_numbers<[1], [0], [0], [1], [0, 0, 1, 1], [], []>} : vector<24x48xbf16>, vector<48x32xbf16>, vector<24x32xf32> -> vector<24x32xf32>
    %c0_4 = arith.constant 0 : index
    %c0_5 = arith.constant 0 : index
    %c0_6 = arith.constant 0 : index
    %5 = vector.load %arg3[%c0_4, %c0_5, %c0_6] : memref<1x24x32xf32, #tpu.memory_space<vmem>>, vector<1x24x32xf32>
    %6 = vector.shape_cast %5 : vector<1x24x32xf32> to vector<24x32xf32>
    %7 = arith.addf %4, %6 : vector<24x32xf32>
    %c0_7 = arith.constant 0 : index
    %c0_8 = arith.constant 0 : index
    %c0_9 = arith.constant 0 : index
    %8 = vector.load %arg4[%c0_7, %c0_8, %c0_9] : memref<1x24x32xf32, #tpu.memory_space<vmem>>, vector<1x24x32xf32>
    %9 = vector.shape_cast %8 : vector<1x24x32xf32> to vector<24x32xf32>
    %10 = vector.shape_cast %7 : vector<24x32xf32> to vector<1x24x32xf32>
    tpu.vector_store %arg4[%c0_7, %c0_8, %c0_9], %10 {strides = array<i32>} : memref<1x24x32xf32, #tpu.memory_space<vmem>>, vector<1x24x32xf32>,
    return
  }
  func.func @transform_0(%arg0: i32) -> (i32, i32, i32) {
    %c0_i32 = arith.constant 0 : i32
    %c0_i32_0 = arith.constant 0 : i32
    %c0_i32_1 = arith.constant 0 : i32
    return %arg0, %c0_i32, %c0_i32_0 : i32, i32, i32
  }
  func.func @transform_1(%arg0: i32) -> (i32, i32) {
    %c0_i32 = arith.constant 0 : i32
    %c0_i32_0 = arith.constant 0 : i32
    %c0_i32_1 = arith.constant 0 : i32
    return %c0_i32, %c0_i32_0 : i32, i32
  }
  func.func @transform_2(%arg0: i32) -> (i32, i32, i32) {
    %c0_i32 = arith.constant 0 : i32
    %c0_i32_0 = arith.constant 0 : i32
    %c0_i32_1 = arith.constant 0 : i32
    %c0_i32_2 = arith.constant 0 : i32
    return %c0_i32, %c0_i32_0, %c0_i32_1 : i32, i32, i32
  }
  func.func @transform_3(%arg0: i32) -> (i32, i32, i32) {
    %c0_i32 = arith.constant 0 : i32
    %c0_i32_0 = arith.constant 0 : i32
    %c0_i32_1 = arith.constant 0 : i32
    return %arg0, %c0_i32, %c0_i32_0 : i32, i32, i32
  }
}

</mosaic_0001>

<bundles_post_ra>
// kernel: tpu_custom_call.1
= control target key start
LH: loop header
LB: loop body
LE: loop exit
PB: predicated region body
PF: predicated region fallthrough
CT: control target
= control target key end

     0   :  { %8 = vsyncpa [#allocation3], 0  ;;  %s688_s0 = inlined_call_operand.hbm [shape: f32[2,24,48], index: 0, kind: input, shape index: {}]   ;;  %s689_s1 = inlined_call_operand.vmem [shape: bf16[48,32], index: 1, kind: input, shape index: {}]   ;;  %s690_s2 = inlined_call_operand.vmem [shape: f32[1,24,32], index: 2, kind: input, shape index: {}]   ;;  %s691_s3 = inlined_call_operand.hbm [shape: f32[2,24,32], index: 3, kind: output, shape index: {}]  }
   0x1   :  { %10 = vsyncpa [#allocation3 + $0x1], 0 }
   0x2   :  { %11 = vsyncpa [#allocation4], 0 }
   0x3   :  { %13 = vsyncpa [#allocation4 + $0x1], 0  ;;  %s546_s12 = smov 0   ;;  %s548_s13 = smov 0  }
   0x4   :  { %s550_s14 = smov 0   ;;  %s552_s15 = smov 0  }
   0x5 LB: > { %s567_s16 = sadd.s32 4294967295, %s520_s15   ;;  %s342_s17 = sadd.s32 4294967294, %s520_s15   ;;  %s520_s15 = sphi %s552_s15, %s699_s15   ;;  %s516_s14 = sphi %s550_s14, %s698_s14   ;;  %s512_s13 = sphi %s548_s13, %s697_s13   ;;  %s508_s12 = sphi %s546_s12, %s696_s12  }
   0x6   : > { %s571_s18 = sadd.s32 1, %s520_s15   ;;  %s26_s19 = sadd.s32 1, %s516_s14 }
   0x7   : > { %s23_s20 = ssub.s32 %s520_s15, %s571_s18  ;;  %p33_p0 = scmp.ne.s32.totalorder %s516_s14, %s512_s13 }
   0x8   : > { %p24_p1 = scmp.eq.s32.totalorder %s23_s20, 0  ;;  %p34_p2 = scmp.eq.s32.totalorder %s520_s15, 0 }
   0x9   : > { %p39_p3 = scmp.ne.s32.totalorder %s512_s13, %s508_s12  ;;  %p40_p4 = scmp.eq.s32.totalorder %s567_s16, 0 }
   0xa   : > { %s583_s21 = scalar_select %p24_p1, %s516_s14, %s26_s19  }
   0xb   : > { %p35_p5 = por %p34_p2, %p33_p0  ;;  %p585_p6 = por %p40_p4, %p39_p3 }
   0xc   : > { %p105_p7 = scmp.eq.s32.totalorder %s567_s16, 1  ;;  %p111_p8 = scmp.eq.s32.totalorder %s342_s17, 1 }
   0xd   : > { %p344_p9 = scmp.ge.s32.totalorder %s520_s15, 2  ;;  %p386_p10 = scmp.lt.s32.totalorder %s520_s15, 2 }
   0xe   : > { %p592_p11 = por %p105_p7, %p33_p0  ;;  %p596_p12 = por %p111_p8, %p39_p3 }
   0xf   : > { %s137_s25 = sand.u32 1, %s516_s14   ;;  %s371_s26 = smul.u32 24, %s520_s15 }
  0x10   : > { %s370_s27 = smul.u32 24, %s137_s25  ;;  %p605_p13 = pnand %p386_p10, %p35_p5 }
  0x11   : > { %s146_s30 = scalar_lea.hbm %s688_s0, %s371_s26  ;;  %s138_s8 = scalar_lea.sflag [#allocation3], %s137_s25 }
  0x12   : > { %s147_s5 = sshll.u32 %s146_s30, 4  ;;  %s141_s6 = scalar_lea.vmem [#allocation2], %s370_s27  ;;  %s148_s5 = int_to_ptr.hbm [resolvable:$true] %s147_s5 }
  0x13   : > { %s149_s7 = sshll.u32 %s141_s6, 4  ;;  %s424_s9 = sshra.s32 %s148_s5, 4  ;;  %s150_s7 = int_to_ptr.vmem [resolvable:$true] %s149_s7  ;;  %s425_s9 = int_to_ptr.hbm [resolvable:$true] %s424_s9 }
  0x14   : > { %s426_s10 = scalar_lea.hbm %s425_s9, 24  ;;  %p428_p1 = pneg %p605_p13 }
  0x15   : > { %p427_p0 = scmp.ne.s32.totalorder %s425_s9, %s426_s10  ;;  %s431_s19 = scalar_lea.hbm %s688_s0, 48 }
  0x16   : > { %p432_p4 = scmp.lt.s32.totalorder %s425_s9, %s688_s0  ;;  %p433_p5 = scmp.lt.s32.totalorder %s431_s19, %s426_s10 }
  0x17   : > { %p429_p2 = pnand %p428_p1, %p427_p0 }
  0x18   : > { %p434_p7 = por %p433_p5, %p432_p4 }
  0x19   : > { %p430_p3 = pneg %p429_p2 }
  0x1b   : > { %p435_p8 = pnand %p434_p7, %p430_p3 }
  0x1d   : > { %438 = shalt.err (!%p435_p8)
}
  0x1e   : > { %s522_s25 = smov 128   ;;  %s523_s27 = smov 8  }
  0x1f   : > { %381 = dma.hbm_to_vmem [thread:$0]  (!%p605_p13), %s148_s5, 384, %s150_s7, %s138_s8, %s522_s25, %s522_s25, %s523_s27  }
  0x20   : > { %p346_p10 = scmp.ge.s32.totalorder %s520_s15, 1  ;;  %p157_p0 = scmp.lt.s32.totalorder %s520_s15, 3 }
  0x22   : > { %p158_p1 = pnand %p346_p10, %p157_p0 }
  0x23   : > { %s622_s28 = sand.u32 (!%p158_p1), 1, %s512_s13  }
  0x24   : > { %161 = sbr.rel (%p158_p1) target bundleno = 194 (0xc2), region = 32  ;;  %s164_s30 = scalar_lea.sflag (!%p158_p1), [#allocation3], %s622_s28 }
  0x25   : > { %s372_s29 = smul.u32 (!%p158_p1), 24, %s622_s28 }
  0x27   : > { %s167_s6 = scalar_lea.vmem (!%p158_p1), [#allocation2], %s372_s29 }
  0x29   : > { %499 = dma.done.wait (%p585_p6), %s164_s30, 384  }
  0x2a   : > { %501 = vsyncadd (%p585_p6), %s164_s30, 4294966912  ;;  %v366_v0 = vld [vmem:[%s689_s1 + $0x10] sm:$0xff]  ;;  %v365_v1 = vld [vmem:[%s689_s1 + $0x8] sm:$0xff]  ;;  %vm224_vm0 = vcmask 392192   ;;  %s373_s20 = smul.u32 24, %s567_s16  ;;  %vm249_vm1 = vcmask 261120  }
  0x2b   : > { %236 = vmatpush.bf16.msra.mxu0 %v366_v0  ;;  %367 = vmatpush.bf16.msra.mxu1 %v366_v0  ;;  %v364_v2 = vld [vmem:[%s689_s1] sm:$0xff]  ;;  %v194_v5 = vld [vmem:[%s167_s6 + $0x10] sm:$0xff]  ;;  %s190_s30 = scalar_lea.vmem [#allocation5], %s372_s29  ;;  %s254_s7 = scalar_lea.sflag [#allocation4], %s622_s28 }
  0x2c   : > { %v192_v3 = vld [vmem:[%s167_s6] sm:$0xff]  ;;  %v193_v4 = vld [vmem:[%s167_s6 + $0x8] sm:$0xff]  ;;  %v196_v7 = vpack.c.bf16 %v194_v5, %v194_v5  ;;  %v205_v9 = vld [vmem:[%s690_s2 + $0x10] sm:$0xff]  ;;  %s265_s27 = scalar_lea.hbm %s691_s3, %s373_s20  ;;  %s266_s6 = sshll.u32 %s190_s30, 4  ;;  %s267_s6 = int_to_ptr.vmem [resolvable:$true] %s266_s6 }
  0x2d   : > { %v195_v6 = vpack.c.bf16 %v193_v4, %v192_v3  ;;  %v203_v8 = vld [vmem:[%s690_s2] sm:$0xff]  ;;  %s268_s4 = sshll.u32 %s265_s27, 4  ;;  %v204_v14 = vld [vmem:[%s690_s2 + $0x8] sm:$0xff]  ;;  %s474_s22 = scalar_lea.hbm %s691_s3, 48  ;;  %s269_s4 = int_to_ptr.hbm [resolvable:$true] %s268_s4 }
  0x2e   : > { %s468_s29 = sshra.s32 %s269_s4, 4  ;;  %s469_s29 = int_to_ptr.hbm [resolvable:$true] %s468_s29 }
  0x2f   : > { %237 = vmatpush.bf16.msra.mxu0 %v365_v1  ;;  %368 = vmatpush.bf16.msra.mxu1 %v365_v1  ;;  %s470_s8 = scalar_lea.hbm %s469_s29, 24  ;;  %p475_p3 = scmp.lt.s32.totalorder %s469_s29, %s691_s3 }
  0x30   : > { %p471_p6 = scmp.ne.s32.totalorder %s469_s29, %s470_s8  ;;  %p476_p4 = scmp.lt.s32.totalorder %s474_s22, %s470_s8 }
  0x32   : > { %p472_p13 = pnand %p471_p6, %p592_p11  ;;  %p477_p5 = por %p476_p4, %p475_p3 }
  0x33   : > { %238 = vmatpush.bf16.msra.mxu0 %v364_v2  ;;  %369 = vmatpush.bf16.msra.mxu1 %v364_v2 }
  0x34   : > { %p473_p2 = pneg %p472_p13 }
  0x36   : > { %359 = vmatmul.msk.bf16.vlgmr.msra.gmra.mxu0 %vm224_vm0, %v195_v6  ;;  %360 = vmatmul.msk.bf16.vlgmr.msra.gmra.mxu1 %vm224_vm0, %v196_v7  ;;  %p478_p7 = pnand %p477_p5, %p473_p2 }
  0xb3   : > { %v240_v10 = vpop.f32.mrf.mxu0  ;;  %v245_v11 = vpop.f32.mrf.mxu1 }
  0xb4   : > { %v241_v12 = vadd.f32 %v240_v10, %v203_v8  ;;  %v246_v13 = vadd.f32 %v245_v11, %v205_v9 }
  0xb6   : > { %250 = vst.msk [vmem:[%s190_s30] sm:$0xff] %vm249_vm1, %v241_v12 }
  0xb7   : > { %252 = vst.msk [vmem:[%s190_s30 + $0x10] sm:$0xff] %vm249_vm1, %v246_v13 }
  0xbb   : > { %v242_v15 = vpop.f32.mrf.mxu0  ;;  %v247_v16 = vpop.f32.mrf.mxu1 }
  0xbc   : > { %v243_v17 = vadd.f32 %v242_v15, %v204_v14 }
  0xbe   : > { %251 = vst.msk [vmem:[%s190_s30 + $0x8] sm:$0xff] %vm249_vm1, %v243_v17 }
  0xbf   : > { %481 = shalt.err (!%p478_p7)
}
  0xc0   : > { %s524_s28 = smov 128   ;;  %s525_s19 = smov 8  }
  0xc1   : > { %376 = dma.vmem_to_hbm [thread:$0]  (%p592_p11), %s267_s6, 384, %s269_s4, %s254_s7, %s524_s28, %s524_s28, %s525_s19  }
  0xc2 PF: > { %s283_s20 = sand.u32 1, %s508_s12   ;;  %p383_p8 = pnand %p344_p9, %p596_p12 }
  0xc3   : > { %s284_s26 = scalar_lea.sflag [#allocation4], %s283_s20 }
  0xc4   : > { %p384_p10 = pneg %p383_p8 }
  0xc6   : > { %503 = dma.done.wait (%p384_p10), %s284_s26, 384  }
  0xc7   : > { %505 = vsyncadd (%p384_p10), %s284_s26, 4294966912  ;;  %p16_p0 = scmp.ge.s32.totalorder %s571_s18, 4   ;;  %s696_s12 = smov %s512_s13 }
  0xc8   : > { %s697_s13 = smov %s516_s14  ;;  %s698_s14 = smov %s583_s21 }
  0xc9   : > { %s699_s15 = smov %s571_s18  ;;  %18 = sbr.rel (!%p16_p0) target bundleno = 5 (0x5), region = 77 }
  0xce   :  { %290 = vsyncpa [#allocation3], 1 }
  0xcf   :  { %292 = vsyncpa [#allocation3 + $0x1], 1 }
  0xd0   :  { %293 = vsyncpa [#allocation4], 1 }
  0xd1   :  { %295 = vsyncpa [#allocation4 + $0x1], 1 }

</bundles_post_ra>
